<compile_context>
chip_gen: v6e
topology: v6e:2x2x1
jax: 0.10.0
libtpu: 0.0.40
codegen_flags: <defaults>
</compile_context>

<pallas_src>
import functools

import jax
import jax.numpy as jnp
from jax.experimental import pallas as pl
from jax.experimental.pallas import tpu as pltpu


def _focal_loss_kernel(x_ref, t_ref, psum_ref, *, gamma, alpha,
                       block_rows, n_rows, n_cols, mask_rows, mask_cols):
    i = pl.program_id(0)

    x = x_ref[...].astype(jnp.float32)   # logits block
    t = t_ref[...].astype(jnp.float32)   # targets block

    # Share a single exp() between sigmoid and the stable softplus term.
    e = jnp.exp(-jnp.abs(x))             # exp(-|x|)          (EUP exp)
    softplus = jnp.log1p(e)              # log(1 + exp(-|x|)) (EUP log)
    r = 1.0 / (1.0 + e)                  # 1/(1 + exp(-|x|))  (EUP recip)
    p = jnp.where(x >= 0.0, r, e * r)    # == sigmoid(x), exact

    # Numerically-stable BCEWithLogits: max(x,0) - x*t + log(1 + exp(-|x|))
    ce = jnp.maximum(x, 0.0) - x * t + softplus

    p_t = p * t + (1.0 - p) * (1.0 - t)
    m = 1.0 - p_t

    # Focal modulation (1 - p_t)**gamma; strength-reduce integer gamma so the
    # common gamma=2 case is two VPU multiplies instead of exp(gamma*log(m)).
    g = float(gamma)
    if g == int(g) and 0 <= int(g) <= 8:
        gi = int(g)
        if gi == 0:
            mod = jnp.ones_like(m)
        else:
            mod = m
            for _ in range(gi - 1):
                mod = mod * m
    else:
        mod = m ** g

    loss = ce * mod

    if alpha is not None:
        a = float(alpha)
        loss = (a * t + (1.0 - a) * (1.0 - t)) * loss

    # Zero out padded rows/cols so they don't contribute to the mean.
    if mask_rows or mask_cols:
        shape = loss.shape
        valid = None
        if mask_rows:
            rows = i * block_rows + jax.lax.broadcasted_iota(jnp.int32, shape, 0)
            valid = rows < n_rows
        if mask_cols:
            cols = jax.lax.broadcasted_iota(jnp.int32, shape, 1)
            cvalid = cols < n_cols
            valid = cvalid if valid is None else jnp.logical_and(valid, cvalid)
        loss = jnp.where(valid, loss, 0.0)

    # One partial sum per block (single cross-lane reduce per multi-MiB tile).
    psum_ref[0, 0] = jnp.sum(loss)


def focal_loss(inputs, targets, *, gamma=2.0, alpha=None, block_rows=None,
               target_block_bytes=2 * 1024 * 1024):
    """Sigmoid focal loss with reduction='mean', computed in a Pallas kernel.

    inputs, targets: same 2-D shape (B, C); any B, C (padded + masked
    internally).  bf16/int inputs are accepted (compute is in f32).
    """
    # TODO(synk): only the module's default reduction='mean' is implemented
    # ('sum'/'none' would need a different output spec).
    assert inputs.shape == targets.shape and inputs.ndim == 2
    B, C = inputs.shape

    # Lane-pad columns to a multiple of 128.
    C_pad = ((C + 127) // 128) * 128

    # Pick a block height targeting ~target_block_bytes of f32 per input block
    # (keeps 2 inputs x 2 pipeline buffers well inside scoped VMEM on
    # v5e/v6e/v7x).
    if block_rows is None:
        rows_for_target = max(1, target_block_bytes // (4 * C_pad))
        block_rows = max(8, (rows_for_target // 8) * 8)
    block_rows = int(block_rows)
    b_ceil = ((B + 7) // 8) * 8
    block_rows = max(8, min((block_rows // 8) * 8, b_ceil))

    B_pad = ((B + block_rows - 1) // block_rows) * block_rows
    G = B_pad // block_rows

    if (B_pad, C_pad) != (B, C):
        inputs = jnp.pad(inputs, ((0, B_pad - B), (0, C_pad - C)))
        targets = jnp.pad(targets, ((0, B_pad - B), (0, C_pad - C)))

    kernel = functools.partial(
        _focal_loss_kernel,
        gamma=float(gamma),
        alpha=None if alpha is None else float(alpha),
        block_rows=block_rows,
        n_rows=B,
        n_cols=C,
        mask_rows=(B_pad != B),
        mask_cols=(C_pad != C),
    )

    partials = pl.pallas_call(
        kernel,
        out_shape=jax.ShapeDtypeStruct((G, 1), jnp.float32),
        grid_spec=pltpu.PrefetchScalarGridSpec(
            num_scalar_prefetch=0,
            grid=(G,),
            in_specs=[
                pl.BlockSpec((block_rows, C_pad), lambda i: (i, 0)),
                pl.BlockSpec((block_rows, C_pad), lambda i: (i, 0)),
            ],
            out_specs=pl.BlockSpec((1, 1), lambda i: (i, 0),
                                   memory_space=pltpu.SMEM),
        ),
        compiler_params=pltpu.CompilerParams(
            dimension_semantics=("parallel",),
            vmem_limit_bytes=32 * 1024 * 1024,
        ),
    )(inputs, targets)

    return jnp.sum(partials) * jnp.float32(1.0 / float(B * C))


def _focal_loss_ref(inputs, targets, gamma=2.0, alpha=None):
    x = inputs.astype(jnp.float32)
    t = targets.astype(jnp.float32)
    p = jax.nn.sigmoid(x)
    ce = jnp.maximum(x, 0.0) - x * t + jnp.log1p(jnp.exp(-jnp.abs(x)))
    p_t = p * t + (1.0 - p) * (1.0 - t)
    loss = ce * (1.0 - p_t) ** gamma
    if alpha is not None:
        loss = (alpha * t + (1.0 - alpha) * (1.0 - t)) * loss
    return loss.mean()


if __name__ == "__main__":
    key = jax.random.PRNGKey(0)
    k1, k2 = jax.random.split(key)
    # Small multi-label classification setup: batch=16, num_labels=256.
    B, C = 16, 256
    logits = jax.random.normal(k1, (B, C), dtype=jnp.float32) * 2.0
    targets = (jax.random.uniform(k2, (B, C)) > 0.7).astype(jnp.float32)

    loss = focal_loss(logits, targets, gamma=2.0, alpha=None)
    loss = jax.block_until_ready(loss)
    ref = _focal_loss_ref(logits, targets, gamma=2.0, alpha=None)
    assert jnp.allclose(loss, ref, rtol=1e-5, atol=1e-6), (loss, ref)

    # Non-aligned shape + alpha path (exercises padding mask).
    x2, t2 = logits[:13, :200], targets[:13, :200]
    loss2 = jax.block_until_ready(focal_loss(x2, t2, gamma=2.0, alpha=0.25))
    ref2 = _focal_loss_ref(x2, t2, gamma=2.0, alpha=0.25)
    assert jnp.allclose(loss2, ref2, rtol=1e-5, atol=1e-6), (loss2, ref2)

    print("KERNEL_OK")
</pallas_src>

<mosaic_0001>
module attributes {stable_mosaic.version = 11 : i64} {
  func.func @_focal_loss_kernel(%arg0: i32, %arg1: memref<16x256xf32, #tpu.memory_space<vmem>>, %arg2: memref<16x256xf32, #tpu.memory_space<vmem>>, %arg3: memref<1x1xf32, #tpu.memory_space<smem>>) attributes {dimension_semantics = [#tpu.dimension_semantics<parallel>], iteration_bounds = array<i64: 1>, scalar_prefetch = 0 : i64, scratch_operands = 0 : i64, tpu.core_type = #tpu.core_type<tc>, window_params = [{transform_indices = @transform_0, window_bounds = array<i64: 16, 256>}, {transform_indices = @transform_1, window_bounds = array<i64: 16, 256>}, {transform_indices = @transform_2, window_bounds = array<i64: 1, 1>}]} {
    %c0 = arith.constant 0 : index
    %c0_0 = arith.constant 0 : index
    %0 = vector.load %arg1[%c0, %c0_0] : memref<16x256xf32, #tpu.memory_space<vmem>>, vector<16x256xf32>
    %c0_1 = arith.constant 0 : index
    %c0_2 = arith.constant 0 : index
    %1 = vector.load %arg2[%c0_1, %c0_2] : memref<16x256xf32, #tpu.memory_space<vmem>>, vector<16x256xf32>
    %2 = math.absf %0 : vector<16x256xf32>
    %cst = arith.constant 0.000000e+00 : f32
    %3 = vector.broadcast %cst : f32 to vector<16x256xf32>
    %4 = arith.subf %3, %2 : vector<16x256xf32>
    %5 = math.exp %4 : vector<16x256xf32>
    %6 = math.log1p %5 : vector<16x256xf32>
    %cst_3 = arith.constant 1.000000e+00 : f32
    %7 = vector.broadcast %cst_3 : f32 to vector<16x256xf32>
    %8 = arith.addf %7, %5 : vector<16x256xf32>
    %cst_4 = arith.constant 1.000000e+00 : f32
    %9 = vector.broadcast %cst_4 : f32 to vector<16x256xf32>
    %10 = arith.divf %9, %8 : vector<16x256xf32>
    %cst_5 = arith.constant 0.000000e+00 : f32
    %11 = vector.broadcast %cst_5 : f32 to vector<16x256xf32>
    %12 = arith.cmpf oge, %0, %11 : vector<16x256xf32>
    %13 = arith.mulf %5, %10 : vector<16x256xf32>
    %14 = arith.select %12, %10, %13 : vector<16x256xi1>, vector<16x256xf32>
    %cst_6 = arith.constant 0.000000e+00 : f32
    %15 = vector.broadcast %cst_6 : f32 to vector<16x256xf32>
    %16 = arith.maximumf %0, %15 : vector<16x256xf32>
    %17 = arith.mulf %0, %1 : vector<16x256xf32>
    %18 = arith.subf %16, %17 : vector<16x256xf32>
    %19 = arith.addf %18, %6 : vector<16x256xf32>
    %20 = arith.mulf %14, %1 : vector<16x256xf32>
    %cst_7 = arith.constant 1.000000e+00 : f32
    %21 = vector.broadcast %cst_7 : f32 to vector<16x256xf32>
    %22 = arith.subf %21, %14 : vector<16x256xf32>
    %cst_8 = arith.constant 1.000000e+00 : f32
    %23 = vector.broadcast %cst_8 : f32 to vector<16x256xf32>
    %24 = arith.subf %23, %1 : vector<16x256xf32>
    %25 = arith.mulf %22, %24 : vector<16x256xf32>
    %26 = arith.addf %20, %25 : vector<16x256xf32>
    %cst_9 = arith.constant 1.000000e+00 : f32
    %27 = vector.broadcast %cst_9 : f32 to vector<16x256xf32>
    %28 = arith.subf %27, %26 : vector<16x256xf32>
    %29 = arith.mulf %28, %28 : vector<16x256xf32>
    %30 = arith.mulf %19, %29 : vector<16x256xf32>
    %31 = vector.shape_cast %30 : vector<16x256xf32> to vector<1x16x256xf32>
    %cst_10 = arith.constant dense<0.000000e+00> : vector<1xf32>
    %32 = vector.multi_reduction <add>, %31, %cst_10 [1, 2] : vector<1x16x256xf32> to vector<1xf32>
    %33 = vector.shape_cast %32 : vector<1xf32> to vector<1x1x1xf32>
    %34 = vector.extract %33[0, 0, 0] : f32 from vector<1x1x1xf32>
    %c0_11 = arith.constant 0 : index
    %c0_12 = arith.constant 0 : index
    %35 = memref.load %arg3[%c0_11, %c0_12] : memref<1x1xf32, #tpu.memory_space<smem>>
    memref.store %34, %arg3[%c0_11, %c0_12] : memref<1x1xf32, #tpu.memory_space<smem>>
    return
  }
  func.func @transform_0(%arg0: i32) -> (i32, i32) {
    %c0_i32 = arith.constant 0 : i32
    %c0_i32_0 = arith.constant 0 : i32
    return %arg0, %c0_i32 : i32, i32
  }
  func.func @transform_1(%arg0: i32) -> (i32, i32) {
    %c0_i32 = arith.constant 0 : i32
    %c0_i32_0 = arith.constant 0 : i32
    return %arg0, %c0_i32 : i32, i32
  }
  func.func @transform_2(%arg0: i32) -> (i32, i32) {
    %c0_i32 = arith.constant 0 : i32
    %c0_i32_0 = arith.constant 0 : i32
    return %arg0, %c0_i32 : i32, i32
  }
}

</mosaic_0001>

<bundles_post_ra>
// kernel: tpu_custom_call.1
= control target key start
LH: loop header
LB: loop body
LE: loop exit
PB: predicated region body
PF: predicated region fallthrough
CT: control target
= control target key end

     0   :  { %7 = vsyncpa [#allocation3], 0  ;;  %s407_s0 = inlined_call_operand.hbm [shape: f32[16,256], index: 0, kind: input, shape index: {}]   ;;  %s408_s1 = inlined_call_operand.hbm [shape: f32[16,256], index: 1, kind: input, shape index: {}]   ;;  %s409_s2 = inlined_call_operand.hbm [shape: f32[1,1], index: 2, kind: output, shape index: {}]  }
   0x1   :  { %8 = vsyncpa [#allocation6], 0 }
   0x2   :  { %9 = vsyncpa [#allocation4], 0  ;;  %s286_s9 = smov [#allocation2]  }
   0x3   :  { %s15_s10 = sshll.u32 %s286_s9, 4  ;;  %s16_s10 = int_to_ptr.vmem [resolvable:$true] %s15_s10 }
   0x4   :  { %s240_s11 = scalar_lea.vmem %s16_s10, 512  ;;  %p245_p1 = scmp.lt.s32.totalorder %s16_s10, %s16_s10 }
   0x5   :  { %p241_p0 = scmp.ne.s32.totalorder %s16_s10, %s240_s11  ;;  %p246_p2 = scmp.lt.s32.totalorder %s240_s11, %s240_s11 }
   0x7   :  { %p247_p3 = por %p246_p2, %p245_p1 }
   0x9   :  { %p248_p4 = pnand %p247_p3, %p241_p0 }
   0xb   :  { %251 = shalt.err (!%p248_p4)
}
   0xc   :  { %s287_s12 = smov 256   ;;  %s288_s13 = smov 16  }
   0xd   :  { %21 = dma.hbm_to_vmem [thread:$0]  %s407_s0, 512, %s16_s10, [#allocation3], %s287_s12, %s287_s12, %s288_s13  }
   0xe   :  { %s289_s16 = smov [#allocation5]  }
   0xf   :  { %s27_s17 = sshll.u32 %s289_s16, 4  ;;  %s28_s17 = int_to_ptr.vmem [resolvable:$true] %s27_s17 }
  0x10   :  { %s260_s18 = scalar_lea.vmem %s28_s17, 512  ;;  %p265_p6 = scmp.lt.s32.totalorder %s28_s17, %s28_s17 }
  0x11   :  { %p261_p5 = scmp.ne.s32.totalorder %s28_s17, %s260_s18  ;;  %p266_p7 = scmp.lt.s32.totalorder %s260_s18, %s260_s18 }
  0x13   :  { %p267_p8 = por %p266_p7, %p265_p6 }
  0x15   :  { %p268_p9 = pnand %p267_p8, %p261_p5 }
  0x17   :  { %271 = shalt.err (!%p268_p9)
}
  0x18   :  { %33 = dma.hbm_to_vmem [thread:$0]  %s408_s1, 512, %s28_s17, [#allocation6], %s287_s12, %s287_s12, %s288_s13  }
  0x19   :  { %280 = dma.done.wait [#allocation3], 512  }
  0x1a   :  { %281 = vsyncadd [#allocation3], 4294966784 }
  0x1b   :  { %282 = dma.done.wait [#allocation6], 512  }
  0x1c   :  { %283 = vsyncadd [#allocation6], 4294966784  ;;  %v312_v0 = vld [vmem:[#allocation2] sm:$0xff]  ;;  %v314_v1 = vld [vmem:[#allocation2 + $0x8] sm:$0xff]  ;;  %s290_s1 = smov [#allocation7]  }
  0x1d   :  { %v316_v2 = vld [vmem:[#allocation2 + $0x10] sm:$0xff]  ;;  %v318_v3 = vld [vmem:[#allocation2 + $0x18] sm:$0xff]  ;;  %v48_v4 = vand.u32 2147483647, %v312_v0  ;;  %v49_v5 = vand.u32 2147483647, %v314_v1 }
  0x1e   :  { %v50_v6 = vand.u32 2147483647, %v316_v2  ;;  %v51_v7 = vand.u32 2147483647, %v318_v3  ;;  %v333_v24 = vld [vmem:[#allocation5] sm:$0xff]  ;;  %v335_v26 = vld [vmem:[#allocation5 + $0x8] sm:$0xff] }
  0x1f   :  { %v52_v8 = vsub.f32 0.0, %v48_v4  ;;  %v53_v9 = vsub.f32 0.0, %v49_v5  ;;  %vm112_vm0 = vcmp.ge.f32.partialorder %v312_v0, 0.0  ;;  %v128_v29 = vmul.f32 %v333_v24, %v312_v0  ;;  %v347_v33 = vld [vmem:[#allocation5 + $0x10] sm:$0xff]  ;;  %v47_v42 = vld [vmem:[#allocation5 + $0x18] sm:$0xff] }
  0x20   :  { %v54_v10 = vsub.f32 0.0, %v50_v6  ;;  %v55_v11 = vsub.f32 0.0, %v51_v7  ;;  %vm113_vm1 = vcmp.ge.f32.partialorder %v314_v1, 0.0  ;;  %v124_v31 = vmax.f32 %v312_v0, 0.0 }
  0x21   :  { %v56_v12 = vmul.f32 1.442695, %v52_v8  ;;  %v58_v13 = vmul.f32 1.442695, %v53_v9  ;;  %v129_v32 = vmul.f32 %v335_v26, %v314_v1  ;;  %vm114_vm2 = vcmp.ge.f32.partialorder %v316_v2, 0.0 }
  0x22   :  { %v60_v14 = vmul.f32 1.442695, %v54_v10  ;;  %v62_v15 = vmul.f32 1.442695, %v55_v11  ;;  %vm115_vm3 = vcmp.ge.f32.partialorder %v318_v3, 0.0  ;;  %v125_v34 = vmax.f32 %v314_v1, 0.0 }
  0x23   :  { %208 = vpow2.f32 %v56_v12  ;;  %v126_v35 = vmax.f32 %v316_v2, 0.0  ;;  %v127_v40 = vmax.f32 %v318_v3, 0.0  ;;  %v130_v46 = vmul.f32 %v347_v33, %v316_v2 }
  0x24   :  { %210 = vpow2.f32 %v58_v13  ;;  %v131_v50 = vmul.f32 %v47_v42, %v318_v3  ;;  %v132_v51 = vsub.f32 %v124_v31, %v128_v29  ;;  %v133_v53 = vsub.f32 %v125_v34, %v129_v32 }
  0x25   :  { %212 = vpow2.f32 %v60_v14  ;;  %v148_v54 = vsub.f32 1.0, %v333_v24  ;;  %v149_v55 = vsub.f32 1.0, %v335_v26  ;;  %v150_v56 = vsub.f32 1.0, %v347_v33 }
  0x26   :  { %214 = vpow2.f32 %v62_v15  ;;  %v151_v61 = vsub.f32 1.0, %v47_v42  ;;  %v134_v32 = vsub.f32 %v126_v35, %v130_v46 }
  0x30   :  { %v209_v16 = vpop.eup %208 }
  0x31   :  { %v324_v17 = vpop.eup %210  ;;  %v64_v19 = vadd.f32 1.0, %v209_v16  ;;  %v67_v25 = vmul.f32 -0.5, %v209_v16  ;;  %v70_v38 = vand.u32 2147483647, %v209_v16 }
  0x32   :  { %v326_v18 = vpop.eup %212  ;;  %v73_v21 = vadd.f32 1.0, %v324_v17  ;;  %v76_v27 = vmul.f32 -0.5, %v324_v17  ;;  %v79_v39 = vand.u32 2147483647, %v324_v17 }
  0x33   :  { %v328_v20 = vpop.eup %214  ;;  %216 = vlog2.f32 %v64_v19  ;;  %v82_v22 = vadd.f32 1.0, %v326_v18  ;;  %v85_v28 = vmul.f32 -0.5, %v326_v18  ;;  %v68_v37 = vadd.f32 1.0, %v67_v25 }
  0x34   :  { %218 = vlog2.f32 %v73_v21  ;;  %v91_v23 = vadd.f32 1.0, %v328_v20  ;;  %v94_v30 = vmul.f32 -0.5, %v328_v20  ;;  %v77_v43 = vadd.f32 1.0, %v76_v27 }
  0x35   :  { %220 = vlog2.f32 %v82_v22  ;;  %v86_v44 = vadd.f32 1.0, %v85_v28  ;;  %v88_v45 = vand.u32 2147483647, %v326_v18  ;;  %v97_v49 = vand.u32 2147483647, %v328_v20 }
  0x36   :  { %222 = vlog2.f32 %v91_v23  ;;  %v95_v48 = vadd.f32 1.0, %v94_v30  ;;  %v69_v58 = vmul.f32 %v209_v16, %v68_v37  ;;  %vm363_vm4 = vcmp.lt.f32.partialorder %v70_v38, 0.0004427343 }
  0x37   :  { %224 = vrcp.f32 %v64_v19  ;;  %vm367_vm5 = vcmp.lt.f32.partialorder %v79_v39, 0.0004427343  ;;  %v78_v63 = vmul.f32 %v324_v17, %v77_v43  ;;  %v87_v4 = vmul.f32 %v326_v18, %v86_v44 }
  0x38   :  { %226 = vrcp.f32 %v73_v21  ;;  %vm373_vm6 = vcmp.lt.f32.partialorder %v88_v45, 0.0004427343  ;;  %v96_v9 = vmul.f32 %v328_v20, %v95_v48  ;;  %vm378_vm7 = vcmp.lt.f32.partialorder %v97_v49, 0.0004427343 }
  0x39   :  { %228 = vrcp.f32 %v82_v22 }
  0x3a   :  { %230 = vrcp.f32 %v91_v23 }
  0x40   :  { %v217_v36 = vpop.eup %216 }
  0x41   :  { %v219_v41 = vpop.eup %218  ;;  %v66_v8 = vmul.f32 0.6931472, %v217_v36  ;;  %v135_v36 = vsub.f32 %v127_v40, %v131_v50 }
  0x42   :  { %v221_v47 = vpop.eup %220  ;;  %v75_v13 = vmul.f32 0.6931472, %v219_v41 }
  0x43   :  { %v223_v52 = vpop.eup %222  ;;  %v84_v14 = vmul.f32 0.6931472, %v221_v47  ;;  %v72_v1 = vsel %vm363_vm4, %v69_v58, %v66_v8 }
  0x44   :  { %v225_v57 = vpop.eup %224  ;;  %v93_v25 = vmul.f32 0.6931472, %v223_v52  ;;  %v81_v2 = vsel %vm367_vm5, %v78_v63, %v75_v13  ;;  %v136_v39 = vadd.f32 %v132_v51, %v72_v1 }
  0x45   :  { %v227_v62 = vpop.eup %226  ;;  %v116_v6 = vmul.f32 %v225_v57, %v209_v16  ;;  %v90_v3 = vsel %vm373_vm6, %v87_v4, %v84_v14  ;;  %v137_v43 = vadd.f32 %v133_v53, %v81_v2 }
  0x46   :  { %v229_v7 = vpop.eup %228  ;;  %v117_v11 = vmul.f32 %v227_v62, %v324_v17  ;;  %v99_v38 = vsel %vm378_vm7, %v96_v9, %v93_v25  ;;  %v138_v47 = vadd.f32 %v134_v32, %v90_v3 }
  0x47   :  { %v231_v12 = vpop.eup %230  ;;  %v118_v15 = vmul.f32 %v229_v7, %v326_v18  ;;  %v120_v19 = vsel %vm112_vm0, %v225_v57, %v116_v6  ;;  %v139_v46 = vadd.f32 %v135_v36, %v99_v38 }
  0x48   :  { %v119_v16 = vmul.f32 %v231_v12, %v328_v20  ;;  %v121_v21 = vsel %vm113_vm1, %v227_v62, %v117_v11  ;;  %v140_v22 = vmul.f32 %v120_v19, %v333_v24  ;;  %v144_v23 = vsub.f32 1.0, %v120_v19 }
  0x49   :  { %v122_v17 = vsel %vm114_vm2, %v229_v7, %v118_v15  ;;  %v141_v27 = vmul.f32 %v121_v21, %v335_v26  ;;  %v145_v28 = vsub.f32 1.0, %v121_v21 }
  0x4a   :  { %v123_v18 = vsel %vm115_vm3, %v231_v12, %v119_v16  ;;  %v142_v0 = vmul.f32 %v122_v17, %v347_v33  ;;  %v146_v29 = vsub.f32 1.0, %v122_v17  ;;  %v152_v20 = vmul.f32 %v148_v54, %v144_v23 }
  0x4b   :  { %v143_v30 = vmul.f32 %v123_v18, %v47_v42  ;;  %v147_v24 = vsub.f32 1.0, %v123_v18  ;;  %v153_v31 = vmul.f32 %v149_v55, %v145_v28 }
  0x4c   :  { %v154_v34 = vmul.f32 %v150_v56, %v146_v29  ;;  %v156_v26 = vadd.f32 %v152_v20, %v140_v22 }
  0x4d   :  { %v155_v37 = vmul.f32 %v151_v61, %v147_v24  ;;  %v157_v33 = vadd.f32 %v153_v31, %v141_v27 }
  0x4e   :  { %v158_v41 = vadd.f32 %v154_v34, %v142_v0  ;;  %v160_v42 = vsub.f32 1.0, %v156_v26 }
  0x4f   :  { %v159_v44 = vadd.f32 %v155_v37, %v143_v30  ;;  %v161_v45 = vsub.f32 1.0, %v157_v33 }
  0x50   :  { %v162_v48 = vsub.f32 1.0, %v158_v41  ;;  %v164_v35 = vmul.f32 %v160_v42, %v160_v42 }
  0x51   :  { %v163_v49 = vsub.f32 1.0, %v159_v44  ;;  %v165_v52 = vmul.f32 %v161_v45, %v161_v45 }
  0x52   :  { %v166_v54 = vmul.f32 %v162_v48, %v162_v48  ;;  %v168_v55 = vmul.f32 %v164_v35, %v136_v39 }
  0x53   :  { %v167_v40 = vmul.f32 %v163_v49, %v163_v49  ;;  %v169_v50 = vmul.f32 %v165_v52, %v137_v43 }
  0x54   :  { %v170_v56 = vmul.f32 %v166_v54, %v138_v47 }
  0x55   :  { %v171_v57 = vmul.f32 %v167_v40, %v139_v46  ;;  %v172_v58 = vadd.f32 %v169_v50, %v168_v55 }
  0x57   :  { %v173_v59 = vadd.f32 %v172_v58, %v170_v56 }
  0x59   :  { %v174_v51 = vadd.f32 %v173_v59, %v171_v57 }
  0x5b   :  { %175 = vadd.xlane.f32.xlu0 %v174_v51 }
  0xe4   :  { %v176_v60 = vpop.xlane.xlu0 %175 }
  0xe5   :  { %v177_v53 = vrot.slane %v176_v60, 4 }
  0xe7   :  { %v178_v61 = vadd.f32 %v177_v53, %v176_v60 }
  0xe9   :  { %v179_v62 = vrot.slane %v178_v61, 2 }
  0xeb   :  { %v180_v63 = vadd.f32 %v179_v62, %v178_v61 }
  0xed   :  { %v181_v4 = vrot.slane %v180_v63, 1 }
  0xef   :  { %v182_v5 = vadd.f32 %v181_v4, %v180_v63 }
  0xf1   :  { %201 = vpush %v182_v5 }
 0x122   :  { %s202_s0 = spop %201 }
 0x123   :  { %185 = sst [smem:[#allocation7]] %s202_s0 }
 0x124   :  { %193 = dma.smem_to_hbm %s290_s1, 16, %s409_s2, [#allocation4]  }
 0x125   :  { %284 = dma.done.wait [#allocation4], 16  }
 0x126   :  { %285 = vsyncadd [#allocation4], 4294967280 }
 0x127   :  { %197 = sfence }
 0x128   :  { %198 = vsyncpa [#allocation3], 1 }
 0x129   :  { %199 = vsyncpa [#allocation6], 1 }
 0x12a   :  { %200 = vsyncpa [#allocation4], 1 }

</bundles_post_ra>
